<compile_context>
chip_gen: v6e
topology: v6e:2x2x1
jax: 0.10.0
libtpu: 0.0.40
codegen_flags: <defaults>
</compile_context>

<pallas_src>
import jax
import jax.numpy as jnp
from jax.experimental import pallas as pl
from jax.experimental.pallas import tpu as pltpu

# ----- model config (small, consistent with the module's forward) -----
F = 4            # n_features
D_IN = 8         # d_feature
D_EMB = 32       # d_embedding
K = F * D_IN     # folded input width  = 32
N = F * D_EMB    # folded output width = 128 (lane-dense)
LN_EPS = 1e-5

TB_MIN = 16      # bf16 sublane packing (16, 128) -> batch tiles in multiples of 16
TB_MAX = 512     # large row tile to amortize per-step overhead


def num_embeddings_kernel(x_ref, w1_ref, w2_ref, p_ref, o_ref):
    x = x_ref[...]                                   # (TB, 32) bf16
    params = p_ref[...]                              # (8, 128) f32: b1/gamma/beta/b2 + pad
    b1, gamma, beta, b2 = (params[0:1, :], params[1:2, :],
                           params[2:3, :], params[3:4, :])

    # per-feature linear #1, folded into one block-diagonal matmul (bf16 MXU, f32 acc)
    h = jnp.dot(x, w1_ref[...], preferred_element_type=jnp.float32) + b1   # (TB, 128)

    # LayerNorm over the folded F*D_EMB = 128 lane dim  (== nn.LayerNorm([F, D_EMB]))
    inv_n = 1.0 / N
    mean = jnp.sum(h, axis=-1, keepdims=True) * inv_n
    ex2 = jnp.sum(h * h, axis=-1, keepdims=True) * inv_n
    var = ex2 - mean * mean                          # biased variance, as torch LayerNorm
    scale = gamma * jax.lax.rsqrt(var + LN_EPS)      # gamma folded into scale
    shift = beta - mean * scale

    # affine LN + ReLU in f32 (no bf16 VPU path on v5e); cast only at the MXU boundary
    y = jnp.maximum(h * scale + shift, 0.0).astype(jnp.bfloat16)

    # per-feature linear #2, block-diagonal matmul
    out = jnp.dot(y, w2_ref[...], preferred_element_type=jnp.float32) + b2
    o_ref[...] = out.astype(o_ref.dtype)


def _block_diag(w):
    """(F, d_in, d_out) per-feature weights -> (F*d_in, F*d_out) block-diagonal matrix."""
    f, di, do = w.shape
    eye = jnp.eye(f, dtype=w.dtype)
    return jnp.einsum('fab,fg->fagb', w, eye).reshape(f * di, f * do)


def prepare_params(w1, b1, gamma, beta, w2, b2):
    """One-time layout prep (hoisted out of the per-call path; run at param load time)."""
    w1_bd = _block_diag(w1).astype(jnp.bfloat16)                 # (32, 128)  bf16
    w2_bd = _block_diag(w2).astype(jnp.bfloat16)                 # (128, 128) bf16
    vecs = jnp.stack([b1.reshape(N), gamma.reshape(N),
                      beta.reshape(N), b2.reshape(N)]).astype(jnp.float32)
    param_block = jnp.concatenate([vecs, jnp.zeros((4, N), jnp.float32)], 0)  # (8, 128)
    return w1_bd, w2_bd, param_block


def _tiling(b):
    # >= 2 grid steps so v7x's 2nd TensorCore always has work; TB multiple of 16, <= 512.
    grid = max(2, pl.cdiv(b, TB_MAX))
    tb = pl.cdiv(pl.cdiv(b, grid), TB_MIN) * TB_MIN
    return tb, grid, grid * tb


def num_embeddings(x, prepared):
    w1_bd, w2_bd, param_block = prepared
    b = x.shape[0]
    assert x.shape[1:] == (F, D_IN)

    # fold features into the lane dim; bf16 MXU operand
    x2d = x.reshape(b, K).astype(jnp.bfloat16)
    tb, grid, b_pad = _tiling(b)
    if b_pad != b:
        x2d = jnp.pad(x2d, ((0, b_pad - b), (0, 0)))

    out2d = pl.pallas_call(
        num_embeddings_kernel,
        out_shape=jax.ShapeDtypeStruct((b_pad, N), jnp.float32),
        grid_spec=pl.GridSpec(
            grid=(grid,),
            in_specs=[
                pl.BlockSpec((tb, K), lambda i: (i, 0)),   # x tile streams with the grid
                pl.BlockSpec((K, N), lambda i: (0, 0)),    # W1 block-diag: VMEM-resident
                pl.BlockSpec((N, N), lambda i: (0, 0)),    # W2 block-diag: VMEM-resident
                pl.BlockSpec((8, N), lambda i: (0, 0)),    # packed b1/gamma/beta/b2
            ],
            out_specs=pl.BlockSpec((tb, N), lambda i: (i, 0)),
        ),
        compiler_params=pltpu.CompilerParams(
            dimension_semantics=("parallel",)),
    )(x2d, w1_bd, w2_bd, param_block)

    return out2d[:b].reshape(b, F, D_EMB)


def reference(x, w1, b1, gamma, beta, w2, b2, mxu_dtype=jnp.float32):
    cast = lambda a: a.astype(mxu_dtype).astype(jnp.float32)
    h = jnp.einsum('bfi,fio->bfo', cast(x), cast(w1)) + b1[None]
    mean = jnp.mean(h, axis=(1, 2), keepdims=True)
    var = jnp.mean((h - mean) ** 2, axis=(1, 2), keepdims=True)   # biased, as torch
    y = (h - mean) / jnp.sqrt(var + LN_EPS) * gamma[None] + beta[None]
    y = jnp.maximum(y, 0.0)
    return jnp.einsum('bfi,fio->bfo', cast(y), cast(w2)) + b2[None]


def init_params(key):
    # Deterministic init mimicking nn.Linear defaults: U(-1/sqrt(d_in), 1/sqrt(d_in)).
    k1, k2, k3, k4 = jax.random.split(key, 4)
    lim1 = 1.0 / jnp.sqrt(D_IN)
    lim2 = 1.0 / jnp.sqrt(D_EMB)
    w1 = jax.random.uniform(k1, (F, D_IN, D_EMB), jnp.float32, -lim1, lim1)
    b1 = jax.random.uniform(k2, (F, D_EMB), jnp.float32, -lim1, lim1)
    w2 = jax.random.uniform(k3, (F, D_EMB, D_EMB), jnp.float32, -lim2, lim2)
    b2 = jax.random.uniform(k4, (F, D_EMB), jnp.float32, -lim2, lim2)
    gamma = jnp.ones((F, D_EMB), jnp.float32)    # LayerNorm default affine
    beta = jnp.zeros((F, D_EMB), jnp.float32)
    return w1, b1, gamma, beta, w2, b2


if __name__ == "__main__":
    B = 16   # small test batch
    key = jax.random.PRNGKey(0)
    kx, kp = jax.random.split(key)
    x = jax.random.normal(kx, (B, F, D_IN), jnp.float32)
    params = init_params(kp)

    prepared = prepare_params(*params)          # hoisted one-time weight/param prep
    out = jax.block_until_ready(num_embeddings(x, prepared))
    assert out.shape == (B, F, D_EMB)
    assert bool(jnp.all(jnp.isfinite(out)))

    # bf16-matched reference: same MXU-operand rounding, f32 math everywhere else
    ref_bf16 = reference(x, *params, mxu_dtype=jnp.bfloat16)
    assert jnp.allclose(out, ref_bf16, rtol=5e-3, atol=5e-3), "mismatch vs bf16-matched reference"

    # loose sanity check against the pure-f32 reference (kernel uses bf16 MXU operands)
    ref_f32 = reference(x, *params)
    assert jnp.allclose(out, ref_f32, rtol=5e-2, atol=5e-2), "mismatch vs f32 reference"

    # TODO(synk): 'batchnorm' (BatchNorm1d running stats) and 'shared_linear' arch
    # options are not exercised by this ['linear','layernorm','relu','linear'] config.
    print("KERNEL_OK")
</pallas_src>

<mosaic_0001>
module attributes {stable_mosaic.version = 11 : i64} {
  func.func @num_embeddings_kernel(%arg0: i32, %arg1: memref<16x32xbf16, #tpu.memory_space<vmem>>, %arg2: memref<32x128xbf16, #tpu.memory_space<vmem>>, %arg3: memref<128x128xbf16, #tpu.memory_space<vmem>>, %arg4: memref<8x128xf32, #tpu.memory_space<vmem>>, %arg5: memref<16x128xf32, #tpu.memory_space<vmem>>) attributes {dimension_semantics = [#tpu.dimension_semantics<parallel>], iteration_bounds = array<i64: 2>, scalar_prefetch = 0 : i64, scratch_operands = 0 : i64, tpu.core_type = #tpu.core_type<tc>, window_params = [{transform_indices = @transform_0, window_bounds = array<i64: 16, 32>}, {pipeline_mode = #tpu.pipeline_mode<synchronous>, transform_indices = @transform_1, window_bounds = array<i64: 32, 128>}, {pipeline_mode = #tpu.pipeline_mode<synchronous>, transform_indices = @transform_2, window_bounds = array<i64: 128, 128>}, {pipeline_mode = #tpu.pipeline_mode<synchronous>, transform_indices = @transform_3, window_bounds = array<i64: 8, 128>}, {transform_indices = @transform_4, window_bounds = array<i64: 16, 128>}]} {
    %c0 = arith.constant 0 : index
    %c0_0 = arith.constant 0 : index
    %0 = vector.load %arg1[%c0, %c0_0] : memref<16x32xbf16, #tpu.memory_space<vmem>>, vector<16x32xbf16>
    %c0_1 = arith.constant 0 : index
    %c0_2 = arith.constant 0 : index
    %1 = vector.load %arg4[%c0_1, %c0_2] : memref<8x128xf32, #tpu.memory_space<vmem>>, vector<8x128xf32>
    %2 = vector.extract_strided_slice %1 {offsets = [0, 0], sizes = [1, 128], strides = [1, 1]} : vector<8x128xf32> to vector<1x128xf32>
    %3 = vector.extract_strided_slice %1 {offsets = [1, 0], sizes = [1, 128], strides = [1, 1]} : vector<8x128xf32> to vector<1x128xf32>
    %4 = vector.extract_strided_slice %1 {offsets = [2, 0], sizes = [1, 128], strides = [1, 1]} : vector<8x128xf32> to vector<1x128xf32>
    %5 = vector.extract_strided_slice %1 {offsets = [3, 0], sizes = [1, 128], strides = [1, 1]} : vector<8x128xf32> to vector<1x128xf32>
    %c0_3 = arith.constant 0 : index
    %c0_4 = arith.constant 0 : index
    %6 = vector.load %arg2[%c0_3, %c0_4] : memref<32x128xbf16, #tpu.memory_space<vmem>>, vector<32x128xbf16>
    %cst = arith.constant dense<0.000000e+00> : vector<16x128xf32>
    %7 = tpu.matmul %0, %6, %cst {dimension_numbers = #tpu.dot_dimension_numbers<[1], [0], [0], [1], [0, 0, 1, 1], [], []>} : vector<16x32xbf16>, vector<32x128xbf16>, vector<16x128xf32> -> vector<16x128xf32>
    %8 = vector.broadcast %2 : vector<1x128xf32> to vector<16x128xf32>
    %9 = arith.addf %7, %8 : vector<16x128xf32>
    %cst_5 = arith.constant dense<0.000000e+00> : vector<16xf32>
    %10 = vector.multi_reduction <add>, %9, %cst_5 [1] : vector<16x128xf32> to vector<16xf32>
    %11 = vector.shape_cast %10 : vector<16xf32> to vector<16x1xf32>
    %cst_6 = arith.constant 7.812500e-03 : f32
    %12 = vector.broadcast %cst_6 : f32 to vector<16x1xf32>
    %13 = arith.mulf %11, %12 : vector<16x1xf32>
    %14 = arith.mulf %9, %9 : vector<16x128xf32>
    %cst_7 = arith.constant dense<0.000000e+00> : vector<16xf32>
    %15 = vector.multi_reduction <add>, %14, %cst_7 [1] : vector<16x128xf32> to vector<16xf32>
    %16 = vector.shape_cast %15 : vector<16xf32> to vector<16x1xf32>
    %cst_8 = arith.constant 7.812500e-03 : f32
    %17 = vector.broadcast %cst_8 : f32 to vector<16x1xf32>
    %18 = arith.mulf %16, %17 : vector<16x1xf32>
    %19 = arith.mulf %13, %13 : vector<16x1xf32>
    %20 = arith.subf %18, %19 : vector<16x1xf32>
    %cst_9 = arith.constant 9.99999974E-6 : f32
    %21 = vector.broadcast %cst_9 : f32 to vector<16x1xf32>
    %22 = arith.addf %20, %21 : vector<16x1xf32>
    %23 = math.rsqrt %22 : vector<16x1xf32>
    %24 = vector.broadcast %3 : vector<1x128xf32> to vector<16x128xf32>
    %25 = vector.broadcast %23 : vector<16x1xf32> to vector<16x128xf32>
    %26 = arith.mulf %24, %25 : vector<16x128xf32>
    %27 = vector.broadcast %13 : vector<16x1xf32> to vector<16x128xf32>
    %28 = arith.mulf %27, %26 : vector<16x128xf32>
    %29 = vector.broadcast %4 : vector<1x128xf32> to vector<16x128xf32>
    %30 = arith.subf %29, %28 : vector<16x128xf32>
    %31 = arith.mulf %9, %26 : vector<16x128xf32>
    %32 = arith.addf %31, %30 : vector<16x128xf32>
    %cst_10 = arith.constant 0.000000e+00 : f32
    %33 = vector.broadcast %cst_10 : f32 to vector<16x128xf32>
    %34 = arith.maximumf %32, %33 : vector<16x128xf32>
    %35 = arith.truncf %34 : vector<16x128xf32> to vector<16x128xbf16>
    %c0_11 = arith.constant 0 : index
    %c0_12 = arith.constant 0 : index
    %36 = vector.load %arg3[%c0_11, %c0_12] : memref<128x128xbf16, #tpu.memory_space<vmem>>, vector<128x128xbf16>
    %cst_13 = arith.constant dense<0.000000e+00> : vector<16x128xf32>
    %37 = tpu.matmul %35, %36, %cst_13 {dimension_numbers = #tpu.dot_dimension_numbers<[1], [0], [0], [1], [0, 0, 1, 1], [], []>} : vector<16x128xbf16>, vector<128x128xbf16>, vector<16x128xf32> -> vector<16x128xf32>
    %38 = vector.broadcast %5 : vector<1x128xf32> to vector<16x128xf32>
    %39 = arith.addf %37, %38 : vector<16x128xf32>
    %c0_14 = arith.constant 0 : index
    %c0_15 = arith.constant 0 : index
    %40 = vector.load %arg5[%c0_14, %c0_15] : memref<16x128xf32, #tpu.memory_space<vmem>>, vector<16x128xf32>
    tpu.vector_store %arg5[%c0_14, %c0_15], %39 {strides = array<i32>} : memref<16x128xf32, #tpu.memory_space<vmem>>, vector<16x128xf32>,
    return
  }
  func.func @transform_0(%arg0: i32) -> (i32, i32) {
    %c0_i32 = arith.constant 0 : i32
    %c0_i32_0 = arith.constant 0 : i32
    return %arg0, %c0_i32 : i32, i32
  }
  func.func @transform_1(%arg0: i32) -> (i32, i32) {
    %c0_i32 = arith.constant 0 : i32
    %c0_i32_0 = arith.constant 0 : i32
    %c0_i32_1 = arith.constant 0 : i32
    return %c0_i32, %c0_i32_0 : i32, i32
  }
  func.func @transform_2(%arg0: i32) -> (i32, i32) {
    %c0_i32 = arith.constant 0 : i32
    %c0_i32_0 = arith.constant 0 : i32
    %c0_i32_1 = arith.constant 0 : i32
    return %c0_i32, %c0_i32_0 : i32, i32
  }
  func.func @transform_3(%arg0: i32) -> (i32, i32) {
    %c0_i32 = arith.constant 0 : i32
    %c0_i32_0 = arith.constant 0 : i32
    %c0_i32_1 = arith.constant 0 : i32
    return %c0_i32, %c0_i32_0 : i32, i32
  }
  func.func @transform_4(%arg0: i32) -> (i32, i32) {
    %c0_i32 = arith.constant 0 : i32
    %c0_i32_0 = arith.constant 0 : i32
    return %arg0, %c0_i32 : i32, i32
  }
}

</mosaic_0001>

<bundles_post_ra>
// kernel: tpu_custom_call.1
= control target key start
LH: loop header
LB: loop body
LE: loop exit
PB: predicated region body
PF: predicated region fallthrough
CT: control target
= control target key end

     0   :  { %9 = vsyncpa [#allocation3], 0  ;;  %s1214_s0 = inlined_call_operand.hbm [shape: bf16[32,32], index: 0, kind: input, shape index: {}]   ;;  %s1215_s1 = inlined_call_operand.hbm [shape: bf16[32,128], index: 1, kind: input, shape index: {}]   ;;  %s1216_s2 = inlined_call_operand.hbm [shape: bf16[128,128], index: 2, kind: input, shape index: {}]   ;;  %s1217_s3 = inlined_call_operand.hbm [shape: f32[8,128], index: 3, kind: input, shape index: {}]   ;;  %s1218_s4 = inlined_call_operand.hbm [shape: f32[32,128], index: 4, kind: output, shape index: {}]  }
   0x1   :  { %11 = vsyncpa [#allocation3 + $0x1], 0 }
   0x2   :  { %12 = vsyncpa [#allocation6], 0 }
   0x3   :  { %13 = vsyncpa [#allocation9], 0 }
   0x4   :  { %14 = vsyncpa [#allocation4], 0 }
   0x5   :  { %16 = vsyncpa [#allocation4 + $0x1], 0  ;;  %s992_s15 = smov 0   ;;  %s994_s16 = smov 0  }
   0x6   :  { %s996_s17 = smov 0   ;;  %s998_s18 = smov 0  }
   0x7 LB: > { %s1013_s19 = sadd.s32 4294967295, %s954_s18   ;;  %s604_s20 = sadd.s32 4294967294, %s954_s18   ;;  %s954_s18 = sphi %s998_s18, %s1241_s18   ;;  %s950_s17 = sphi %s996_s17, %s1240_s17   ;;  %s946_s16 = sphi %s994_s16, %s1239_s16   ;;  %s942_s15 = sphi %s992_s15, %s1238_s15  }
   0x8   : > { %p42_p0 = scmp.ne.s32.totalorder %s946_s16, %s942_s15  ;;  %p1219_p1 = scmp.eq.s32.totalorder %s1013_s19, 0 }
   0x9   : > { %p129_p2 = scmp.eq.s32.totalorder %s1013_s19, 1  ;;  %p135_p3 = scmp.eq.s32.totalorder %s604_s20, 1 }
   0xa   : > { %p1022_p4 = por %p1219_p1, %p42_p0  ;;  %p605_p5 = scmp.ge.s32.totalorder %s954_s18, 1 }
   0xb   : > { %p1027_p6 = por %p135_p3, %p42_p0  ;;  %p142_p7 = scmp.lt.s32.totalorder %s954_s18, 3 }
   0xc   : > { %s1223_s21 = scalar_select %p1022_p4, 1, 0 }
   0xd   : > { %s1224_s22 = scalar_select %p1027_p6, 1, 0 }
   0xe   : > { %p1032_p8 = pnand %p605_p5, %p142_p7  ;;  %s956_s24 = smov [#allocation5]  }
   0xf   : > { %s154_s25 = sshll.u32 %s956_s24, 4  ;;  %s957_s27 = smov [#allocation7]   ;;  %s155_s25 = int_to_ptr.vmem [resolvable:$true] %s154_s25 }
  0x10   : > { %s1225_s23 = scalar_select %p1032_p8, 1, 0 }
  0x11   : > { %p694_p9 = pneg %p1032_p8  ;;  %s167_s28 = sshll.u32 %s957_s27, 4  ;;  %s168_s28 = int_to_ptr.vmem [resolvable:$true] %s167_s28 }
  0x12   : > { %s958_s29 = smov [#allocation8]   ;;  %s787_s5 = scalar_lea.vmem %s155_s25, 256 }
  0x13   : > { %p1041_p11 = pnand %p694_p9, %p1219_p1  ;;  %s181_s30 = sshll.u32 %s958_s29, 4  ;;  %s182_s30 = int_to_ptr.vmem [resolvable:$true] %s181_s30 }
  0x14   : > { %p788_p13 = scmp.ne.s32.totalorder %s155_s25, %s787_s5  ;;  %p795_p5 = scmp.lt.s32.totalorder %s155_s25, %s155_s25 }
  0x15   : > { %p778_p12 = pneg %p1041_p11  ;;  %p796_p7 = scmp.lt.s32.totalorder %s787_s5, %s787_s5 }
  0x17   : > { %p790_p0 = pnand %p788_p13, %p778_p12  ;;  %p797_p9 = por %p796_p7, %p795_p5 }
  0x19   : > { %p791_p3 = pneg %p790_p0 }
  0x1b   : > { %p798_p10 = pnand %p797_p9, %p791_p3 }
  0x1d   : > { %801 = shalt.err (!%p798_p10)
}
  0x1e   : > { %s959_s6 = smov 64   ;;  %s960_s7 = smov 4  }
  0x1f   : > { %697 = dma.hbm_to_vmem [thread:$0]  (!%p1041_p11), %s1215_s1, 256, %s155_s25, [#allocation6], %s959_s6, %s959_s6, %s960_s7  }
  0x20   : > { %s813_s10 = scalar_lea.vmem %s168_s28, 1024  ;;  %p821_p3 = scmp.lt.s32.totalorder %s168_s28, %s168_s28 }
  0x21   : > { %p814_p13 = scmp.ne.s32.totalorder %s168_s28, %s813_s10  ;;  %p822_p10 = scmp.lt.s32.totalorder %s813_s10, %s813_s10 }
  0x23   : > { %p816_p0 = pnand %p814_p13, %p778_p12  ;;  %p823_p7 = por %p822_p10, %p821_p3 }
  0x25   : > { %p817_p5 = pneg %p816_p0 }
  0x27   : > { %p824_p9 = pnand %p823_p7, %p817_p5 }
  0x29   : > { %827 = shalt.err (!%p824_p9)
}
  0x2a   : > { %700 = dma.hbm_to_vmem [thread:$0]  (!%p1041_p11), %s1216_s2, 1024, %s168_s28, [#allocation6], %s959_s6, %s959_s6, %s960_s7  }
  0x2b   : > { %s839_s13 = scalar_lea.vmem %s182_s30, 128  ;;  %p847_p3 = scmp.lt.s32.totalorder %s182_s30, %s182_s30 }
  0x2c   : > { %p840_p1 = scmp.ne.s32.totalorder %s182_s30, %s839_s13  ;;  %p848_p5 = scmp.lt.s32.totalorder %s839_s13, %s839_s13 }
  0x2e   : > { %p842_p13 = pnand %p840_p1, %p778_p12  ;;  %p849_p10 = por %p848_p5, %p847_p3 }
  0x30   : > { %p843_p0 = pneg %p842_p13 }
  0x32   : > { %p850_p7 = pnand %p849_p10, %p843_p0 }
  0x34   : > { %853 = shalt.err (!%p850_p7)
}
  0x35   : > { %703 = dma.hbm_to_vmem [thread:$0]  (!%p1041_p11), %s1217_s3, 128, %s182_s30, [#allocation9]  }
  0x36   : > { %s1078_s24 = sadd.s32 1, %s954_s18   ;;  %s29_s26 = sadd.s32 1, %s950_s17 }
  0x37   : > { %s26_s25 = ssub.s32 %s954_s18, %s1078_s24  ;;  %p36_p12 = scmp.ne.s32.totalorder %s950_s17, %s946_s16 }
  0x38   : > { %p27_p1 = scmp.eq.s32.totalorder %s26_s25, 0  ;;  %p37_p9 = scmp.eq.s32.totalorder %s954_s18, 0 }
  0x39   : > { %p715_p13 = scmp.lt.s32.totalorder %s954_s18, 2  ;;  %p1092_p3 = por %p129_p2, %p36_p12 }
  0x3a   : > { %s1088_s27 = scalar_select %p27_p1, %s950_s17, %s29_s26  }
  0x3b   : > { %p38_p0 = por %p37_p9, %p36_p12  ;;  %s192_s29 = sand.u32 1, %s950_s17  }
  0x3c   : > { %s1227_s28 = scalar_select %p1092_p3, 1, 0 }
  0x3d   : > { %s636_s5 = sshll.u32 %s954_s18, 7  ;;  %s610_s30 = sshll.u32 %s192_s29, 3 }
  0x3e   : > { %s1101_s10 = scalar_lea.hbm %s1214_s0, %s636_s5  ;;  %s196_s11 = scalar_lea.vmem [#allocation2], %s610_s30 }
  0x3f   : > { %s203_s12 = sshll.u32 %s196_s11, 4  ;;  %p1103_p11 = pnand %p715_p13, %p38_p0  ;;  %s1107_s12 = int_to_ptr.vmem [resolvable:$true] %s203_s12 }
  0x40   : > { %s1109_s14 = scalar_lea.sflag [#allocation3], %s192_s29  ;;  %s854_s20 = scalar_lea.hbm %s1101_s10, 128 }
  0x41   : > { %p855_p2 = scmp.ne.s32.totalorder %s1101_s10, %s854_s20  ;;  %p856_p5 = pneg %p1103_p11 }
  0x42   : > { %s859_s5 = scalar_lea.hbm %s1214_s0, 256  ;;  %p860_p1 = scmp.lt.s32.totalorder %s1101_s10, %s1214_s0 }
  0x43   : > { %p857_p10 = pnand %p856_p5, %p855_p2  ;;  %p861_p12 = scmp.lt.s32.totalorder %s859_s5, %s854_s20 }
  0x45   : > { %p858_p7 = pneg %p857_p10  ;;  %p862_p9 = por %p861_p12, %p860_p1 }
  0x47   : > { %p863_p13 = pnand %p862_p9, %p858_p7 }
  0x49   : > { %866 = shalt.err (!%p863_p13)
}
  0x4a   : > { %s867_s29 = scalar_lea.vmem %s1107_s12, 128  ;;  %s961_s9 = smov [#allocation2]  }
  0x4b   : > { %p868_p0 = scmp.ne.s32.totalorder %s1107_s12, %s867_s29  ;;  %s872_s11 = sshll.u32 %s961_s9, 4  ;;  %s873_s11 = int_to_ptr.vmem [resolvable:$false] %s872_s11 }
  0x4c   : > { %s874_s25 = scalar_lea.vmem %s873_s11, 256  ;;  %p875_p10 = scmp.lt.s32.totalorder %s1107_s12, %s873_s11 }
  0x4d   : > { %p870_p6 = pnand %p868_p0, %p856_p5  ;;  %p876_p3 = scmp.lt.s32.totalorder %s874_s25, %s867_s29 }
  0x4f   : > { %p871_p2 = pneg %p870_p6  ;;  %p877_p4 = por %p876_p3, %p875_p10 }
  0x51   : > { %p878_p8 = pnand %p877_p4, %p871_p2 }
  0x53   : > { %881 = shalt.err (!%p878_p8)
}
  0x54   : > { %707 = dma.hbm_to_vmem [thread:$0]  (!%p1103_p11), %s1101_s10, 128, %s1107_s12, %s1109_s14, %s959_s6, %s959_s6, %s960_s7  }
  0x55   : > { %p1229_p6 = scmp.ne.s32.totalorder %s1225_s23, 0 }
  0x56   : > { %s1136_s20 = sand.u32 (!%p1229_p6), 1, %s946_s16   ;;  %p1230_p4 = scmp.ne.s32.totalorder (!%p1229_p6), %s1223_s21, 0 }
  0x57   : > { %215 = sbr.rel (%p1229_p6) target bundleno = 694 (0x2b6), region = 36  ;;  %s614_s26 = sshll.u32 (!%p1229_p6), %s1136_s20, 3 }
  0x58   : > { %s218_s5 = scalar_lea.sflag (!%p1229_p6), [#allocation3], %s1136_s20  ;;  %s221_s30 = scalar_lea.vmem (!%p1229_p6), [#allocation2], %s614_s26 }
  0x5c   : > { %925 = dma.done.wait (%p1230_p4), %s218_s5, 128  }
  0x5d   : > { %927 = vsyncadd (%p1230_p4), %s218_s5, 4294967168  ;;  %p1231_p8 = scmp.eq.s32.totalorder %s1013_s19, 0 }
  0x5f   : > { %929 = dma.done.wait (%p1231_p8), [#allocation6], 1280   ;;  %p1232_p3 = pmov %p1231_p8 }
  0x61   : > { %931 = vsyncadd (%p1232_p3), [#allocation6], 4294966016  ;;  %p1233_p11 = pmov %p1232_p3 }
  0x62   : > { %p1234_p5 = pmov %p1232_p3 }
  0x63   : > { %933 = dma.done.wait (%p1233_p11), [#allocation9], 128  }
  0x64   : > { %935 = vsyncadd (%p1234_p5), [#allocation9], 4294967168  ;;  %v962_v0 = vmov 0.0   ;;  %vm963_vm0 = vmmov 0   ;;  %v761_v1 = vld [vmem:[#allocation5 + $0x8] sm:$0xff]   ;;  %v762_v2 = vld [vmem:[#allocation5] sm:$0xff]   ;;  %v268_v4 = vlaneseq }
  0x65   : > { %650 = vmatprep.subr.bf16.mxu0 %v962_v0  ;;  %654 = vmatprep.mubr.msk.bf16.mxu0 %vm963_vm0, %v962_v0  ;;  %v763_v3 = vld [vmem:[%s221_s30] sm:$0xff]   ;;  %vm289_vm1 = vcmask 261120   ;;  %v764_v17 = vld [vmem:[#allocation7 + $0x38] sm:$0xff]   ;;  %v765_v18 = vld [vmem:[#allocation7 + $0x30] sm:$0xff]   ;;  %s618_s21 = sshll.u32 %s1136_s20, 4  ;;  %s637_s7 = sshll.u32 %s1013_s19, 8 }
  0x66   : > { %658 = vmatprep.subr.bf16.mxu1 %v962_v0  ;;  %674 = vmatprep.mubr.msk.bf16.mxu1 %vm963_vm0, %v962_v0  ;;  %v1152_v5 = vshrl.u32 %v268_v4, 7  ;;  %v1155_v7 = vld [vmem:[#allocation8] sm:$0xff]  ;;  %v766_v19 = vld [vmem:[#allocation7 + $0x28] sm:$0xff]   ;;  %v768_v21 = vld [vmem:[#allocation7 + $0x18] sm:$0xff]   ;;  %s257_s23 = scalar_lea.vmem [#allocation10], %s618_s21  ;;  %s1171_s13 = scalar_lea.hbm %s1218_s4, %s637_s7 }
  0x67   : > { %651 = vmatpush3.bf16.msra.mxu0 %v761_v1  ;;  %659 = vmatpush3.bf16.msra.mxu1 %v764_v17  ;;  %v767_v20 = vld [vmem:[#allocation7 + $0x20] sm:$0xff]   ;;  %v769_v22 = vld [vmem:[#allocation7 + $0x10] sm:$0xff]   ;;  %v770_v23 = vld [vmem:[#allocation7 + $0x8] sm:$0xff]   ;;  %s502_s6 = sshll.u32 %s257_s23, 4  ;;  %s489_s14 = scalar_lea.sflag [#allocation4], %s1136_s20  ;;  %s1166_s6 = int_to_ptr.vmem [resolvable:$true] %s502_s6 }
  0x68   : > { %652 = vmatprep.subr.bf16.mxu0 %v962_v0  ;;  %v270_v6 = vsub.s32 0, %v1152_v5  ;;  %660 = vmatprep.subr.bf16.mxu1 %v962_v0  ;;  %v771_v24 = vld [vmem:[#allocation7] sm:$0xff]   ;;  %v358_v39 = vsub.s32 1, %v1152_v5  ;;  %v366_v41 = vsub.s32 2, %v1152_v5  ;;  %v395_v58 = vsub.s32 3, %v1152_v5  ;;  %s882_s8 = scalar_lea.vmem %s1166_s6, 256 }
  0x69   : > { %p883_p7 = scmp.ne.s32.totalorder %s1166_s6, %s882_s8  ;;  %p1235_p1 = scmp.ne.s32.totalorder %s1227_s28, 0 }
  0x6a   : > { %v271_v8 = vrot.slane %v1155_v7, %v270_v6  ;;  %v359_v40 = vrot.slane %v1155_v7, %v358_v39  ;;  %v367_v44 = vrot.slane %v1155_v7, %v366_v41  ;;  %v396_v59 = vrot.slane %v1155_v7, %v395_v58  ;;  %s964_s19 = smov [#allocation10]  }
  0x6b   : > { %653 = vmatpush3.bf16.msra.mxu0 %v762_v2  ;;  %661 = vmatpush3.bf16.msra.mxu1 %v765_v18  ;;  %p884_p12 = pnand %p883_p7, %p1235_p1  ;;  %s886_s29 = sshll.u32 %s964_s19, 4  ;;  %s887_s29 = int_to_ptr.vmem [resolvable:$false] %s886_s29 }
  0x6c   : > { %662 = vmatprep.subr.bf16.mxu1 %v962_v0  ;;  %s888_s9 = scalar_lea.vmem %s887_s29, 512  ;;  %p889_p13 = scmp.lt.s32.totalorder %s1166_s6, %s887_s29 }
  0x6d   : > { %p885_p9 = pneg %p884_p12  ;;  %p890_p0 = scmp.lt.s32.totalorder %s888_s9, %s882_s8 }
  0x6e   : > { %655 = vmatmul.mubr.msk.bf16.vlgmr.msra.gmra.mxu0 %vm289_vm1, %v763_v3 }
  0x6f   : > { %663 = vmatpush3.bf16.msra.mxu1 %v766_v19  ;;  %p891_p2 = por %p890_p0, %p889_p13 }
  0x70   : > { %664 = vmatprep.subr.bf16.mxu1 %v962_v0 }
  0x71   : > { %p892_p10 = pnand %p891_p2, %p885_p9 }
  0x73   : > { %665 = vmatpush3.bf16.msra.mxu1 %v767_v20 }
  0x74   : > { %666 = vmatprep.subr.bf16.mxu1 %v962_v0 }
  0x77   : > { %667 = vmatpush3.bf16.msra.mxu1 %v768_v21 }
  0x78   : > { %668 = vmatprep.subr.bf16.mxu1 %v962_v0 }
  0x7b   : > { %669 = vmatpush3.bf16.msra.mxu1 %v769_v22 }
  0x7c   : > { %670 = vmatprep.subr.bf16.mxu1 %v962_v0 }
  0x7f   : > { %671 = vmatpush3.bf16.msra.mxu1 %v770_v23 }
  0x80   : > { %672 = vmatprep.subr.bf16.mxu1 %v962_v0 }
  0x83   : > { %673 = vmatpush3.bf16.msra.mxu1 %v771_v24 }
 0x12e   : > { %v327_v9 = vpop.f32.mrf.mxu0 }
 0x12f   : > { %v328_v10 = vadd.f32 %v327_v9, %v271_v8 }
 0x130   : > { %v656_v11 = vpop.f32.mrf.mxu0 }
 0x131   : > { %334 = vadd.xlane.f32.xlu0 %v328_v10  ;;  %v340_v12 = vmul.f32 %v328_v10, %v328_v10 }
 0x132   : > { %v330_v13 = vpop.f32.mrf.mxu0 }
 0x133   : > { %v331_v14 = vadd.f32 %v330_v13, %v271_v8  ;;  %342 = vadd.xlane.f32.xlu1 %v340_v12 }
 0x134   : > { %v657_v15 = vpop.f32.mrf.mxu0 }
 0x135   : > { %336 = vadd.xlane.f32.xlu0 %v331_v14  ;;  %v341_v16 = vmul.f32 %v331_v14, %v331_v14 }
 0x137   : > { %344 = vadd.xlane.f32.xlu1 %v341_v16 }
 0x1ba   : > { %v335_v25 = vpop.xlane.xlu0 %334 }
 0x1bb   : > { %v338_v26 = vmul.f32 0.0078125, %v335_v25 }
 0x1bc   : > { %v343_v27 = vpop.xlane.xlu1 %342 }
 0x1bd   : > { %v348_v28 = vmul.f32 %v338_v26, %v338_v26  ;;  %v346_v29 = vmul.f32 0.0078125, %v343_v27 }
 0x1be   : > { %v337_v30 = vpop.xlane.xlu0 %336 }
 0x1bf   : > { %v350_v31 = vsub.f32 %v346_v29, %v348_v28  ;;  %v339_v32 = vmul.f32 0.0078125, %v337_v30 }
 0x1c0   : > { %v345_v33 = vpop.xlane.xlu1 %344 }
 0x1c1   : > { %v352_v34 = vadd.f32 1e-05, %v350_v31  ;;  %v349_v35 = vmul.f32 %v339_v32, %v339_v32  ;;  %v347_v36 = vmul.f32 0.0078125, %v345_v33 }
 0x1c3   : > { %772 = vrsqrt.f32 %v352_v34  ;;  %v351_v37 = vsub.f32 %v347_v36, %v349_v35 }
 0x1c5   : > { %v353_v38 = vadd.f32 1e-05, %v351_v37 }
 0x1c7   : > { %774 = vrsqrt.f32 %v353_v38 }
 0x1d0   : > { %v773_v42 = vpop.eup %772 }
 0x1d1   : > { %v360_v43 = vmul.f32 %v773_v42, %v359_v40 }
 0x1d3   : > { %v362_v45 = vmul.f32 %v360_v43, %v338_v26  ;;  %v370_v50 = vmul.f32 %v360_v43, %v328_v10 }
 0x1d4   : > { %v775_v46 = vpop.eup %774 }
 0x1d5   : > { %v361_v47 = vmul.f32 %v775_v46, %v359_v40  ;;  %v368_v48 = vsub.f32 %v367_v44, %v362_v45 }
 0x1d7   : > { %v363_v49 = vmul.f32 %v361_v47, %v339_v32  ;;  %v371_v52 = vmul.f32 %v361_v47, %v331_v14  ;;  %v372_v53 = vadd.f32 %v370_v50, %v368_v48 }
 0x1d9   : > { %v369_v51 = vsub.f32 %v367_v44, %v363_v49  ;;  %v374_v55 = vmax.f32 %v372_v53, 0.0 }
 0x1db   : > { %v373_v54 = vadd.f32 %v371_v52, %v369_v51 }
 0x1dd   : > { %v375_v56 = vmax.f32 %v373_v54, 0.0 }
 0x1df   : > { %v376_v57 = vpack.c.bf16 %v375_v56, %v374_v55 }
 0x1e1   : > { %675 = vmatmul.mubr.bf16.vlgmr.msra.gmra.mxu1 %v376_v57 }
 0x2a1   : > { %v479_v60 = vpop.f32.mrf.mxu1 }
 0x2a2   : > { %v480_v61 = vadd.f32 %v479_v60, %v396_v59 }
 0x2a3   : > { %v676_v62 = vpop.f32.mrf.mxu1 }
 0x2a4   : > { %486 = vst [vmem:[%s257_s23] sm:$0xff] %v480_v61 }
 0x2a5   : > { %v482_v63 = vpop.f32.mrf.mxu1 }
 0x2a6   : > { %v483_v0 = vadd.f32 %v482_v63, %v396_v59 }
 0x2a7   : > { %v677_v1 = vpop.f32.mrf.mxu1 }
 0x2a8   : > { %487 = vst [vmem:[%s257_s23 + $0x8] sm:$0xff] %v483_v0 }
 0x2a9   : > { %895 = shalt.err (!%p892_p10)
}
 0x2aa   : > { %s896_s11 = scalar_lea.hbm %s1171_s13, 256  ;;  %s900_s5 = scalar_lea.hbm %s1218_s4, 512 }
 0x2ab   : > { %p897_p6 = scmp.ne.s32.totalorder %s1171_s13, %s896_s11  ;;  %p901_p3 = scmp.lt.s32.totalorder %s1171_s13, %s1218_s4 }
 0x2ac   : > { %p902_p11 = scmp.lt.s32.totalorder %s900_s5, %s896_s11 }
 0x2ad   : > { %p898_p4 = pnand %p897_p6, %p1235_p1 }
 0x2ae   : > { %p903_p5 = por %p902_p11, %p901_p3 }
 0x2af   : > { %p899_p8 = pneg %p898_p4 }
 0x2b1   : > { %p904_p7 = pnand %p903_p5, %p899_p8 }
 0x2b3   : > { %907 = shalt.err (!%p904_p7)
}
 0x2b4   : > { %s965_s23 = smov 128   ;;  %s966_s7 = smov 8  }
 0x2b5   : > { %692 = dma.vmem_to_hbm [thread:$0]  (%p1235_p1), %s1166_s6, 256, %s1171_s13, %s489_s14, %s965_s23, %s965_s23, %s966_s7  }
 0x2b6 PF: > { %s517_s10 = sand.u32 1, %s942_s15   ;;  %p1236_p12 = scmp.ne.s32.totalorder %s1224_s22, 0 }
 0x2b7   : > { %p1237_p9 = scmp.ge.s32.totalorder %s954_s18, 2  ;;  %s518_s12 = scalar_lea.sflag [#allocation4], %s517_s10 }
 0x2b9   : > { %p709_p13 = pnand %p1237_p9, %p1236_p12 }
 0x2bb   : > { %p710_p0 = pneg %p709_p13 }
 0x2bd   : > { %937 = dma.done.wait (%p710_p0), %s518_s12, 256  }
 0x2be   : > { %939 = vsyncadd (%p710_p0), %s518_s12, 4294967040  ;;  %p19_p2 = scmp.ge.s32.totalorder %s1078_s24, 4   ;;  %s1238_s15 = smov %s946_s16 }
 0x2bf   : > { %s1239_s16 = smov %s950_s17  ;;  %s1240_s17 = smov %s1088_s27 }
 0x2c0   : > { %s1241_s18 = smov %s1078_s24  ;;  %21 = sbr.rel (!%p19_p2) target bundleno = 7 (0x7), region = 93 }
 0x2c5   :  { %523 = vsyncpa [#allocation3], 1 }
 0x2c6   :  { %525 = vsyncpa [#allocation3 + $0x1], 1 }
 0x2c7   :  { %526 = vsyncpa [#allocation6], 1 }
 0x2c8   :  { %527 = vsyncpa [#allocation9], 1 }
 0x2c9   :  { %528 = vsyncpa [#allocation4], 1 }
 0x2ca   :  { %530 = vsyncpa [#allocation4 + $0x1], 1 }

</bundles_post_ra>
